<compile_context>
chip_gen: v7x
topology: tpu7x:2x2x1
jax: 0.10.0
libtpu: 0.0.40
codegen_flags: <defaults>
</compile_context>

<pallas_src>
import jax
import jax.numpy as jnp
from jax.experimental import pallas as pl
from jax.experimental.pallas import tpu as pltpu


LANE = 128          # batch-tile granularity (lane width)
OUT_PAD = 8         # fc5 output rows padded 6 -> 8 (one native sublane tile)
NEG_BIG = -1e30     # bias on padded logit rows -> exp() == 0 exactly


def mlp_kernel(x_ref,
               w1_ref, b1_ref,
               w2_ref, b2_ref,
               w3_ref, b3_ref,
               w4_ref, b4_ref,
               w5_ref, b5_ref,
               o_ref):
    """One batch tile (features x batch): fc1..fc4 + ReLU, fc5, softmax over rows."""
    x = x_ref[...]                                     # (8, TB) f32

    def linear(h, w_ref, b_ref):
        # bf16 only feeds the MXU; accumulate + bias add stay f32.
        return jnp.dot(w_ref[...], h.astype(jnp.bfloat16),
                       preferred_element_type=jnp.float32) + b_ref[...]

    h = jnp.maximum(linear(x, w1_ref, b1_ref), 0.0)    # (H, TB)
    h = jnp.maximum(linear(h, w2_ref, b2_ref), 0.0)
    h = jnp.maximum(linear(h, w3_ref, b3_ref), 0.0)
    h = jnp.maximum(linear(h, w4_ref, b4_ref), 0.0)
    logits = linear(h, w5_ref, b5_ref)                 # (8, TB); rows 6,7 ~ -1e30

    # Softmax over the feature (sublane) axis — padded rows contribute
    # exp(-huge) == 0, so this equals softmax over the 6 real logits.
    m = jnp.max(logits, axis=0, keepdims=True)         # (1, TB)
    e = jnp.exp(logits - m)
    denom = jnp.sum(e, axis=0, keepdims=True)
    o_ref[...] = (e * pl.reciprocal(denom, approx=True)).astype(o_ref.dtype)


def net_forward(x, params, *, block_rows=2048, min_grid_steps=2):
    """x: (B, input_size) f32; params: list of (W, b) with W shaped (in, out).

    Returns (B, output_size) f32, matching the PyTorch module's forward.
    """
    B, f_in = x.shape
    H = params[0][0].shape[1]
    out_size = params[-1][0].shape[1]
    n_layers = len(params)

    # Stage parameters feature-major: W_k = W.T -> (out, in) bf16, b_k -> (out, 1) f32.
    # Last layer padded to OUT_PAD rows: zero weight rows, -1e30 bias (kept in f32!).
    staged = []
    for li, (w, b) in enumerate(params):
        w_k = jnp.asarray(w, jnp.float32).T                 # (out, in)
        b_k = jnp.asarray(b, jnp.float32).reshape(-1, 1)    # (out, 1)
        if li == n_layers - 1:
            pad = OUT_PAD - w_k.shape[0]
            w_k = jnp.pad(w_k, ((0, pad), (0, 0)))                            # zero rows
            b_k = jnp.pad(b_k, ((0, pad), (0, 0)), constant_values=NEG_BIG)   # -inf-ish
        staged.append(w_k.astype(jnp.bfloat16))
        staged.append(b_k)

    # Batch tiling: batch lives on the lane axis. Tiles as large as possible
    # (fewer ~0.35 us grid steps) but >= min_grid_steps so both v7x TCs get work.
    tb = max(LANE, min(block_rows, pl.cdiv(B, min_grid_steps)))
    tb = ((tb + LANE - 1) // LANE) * LANE                # multiple of 128 lanes
    B_pad = ((B + tb - 1) // tb) * tb
    n_steps = B_pad // tb

    # Feature-major input; zero-pad extra batch columns (never read back).
    x_t = jnp.pad(jnp.asarray(x, jnp.float32).T, ((0, 0), (0, B_pad - B)))

    flops = 2 * B_pad * (f_in * H + 3 * H * H + H * OUT_PAD)
    bytes_accessed = (x_t.size * 4 + B_pad * OUT_PAD * 4
                      + sum(int(p.size) * p.dtype.itemsize for p in staged))
    cost = pl.CostEstimate(flops=flops,
                           transcendentals=B_pad * (OUT_PAD + 1),
                           bytes_accessed=bytes_accessed)

    in_specs = [pl.BlockSpec((f_in, tb), lambda i: (0, i))]
    # Weights/biases: same block every grid step -> fetched once, stay VMEM-resident.
    in_specs += [pl.BlockSpec(p.shape, lambda i: (0, 0)) for p in staged]
    out_spec = pl.BlockSpec((OUT_PAD, tb), lambda i: (0, i))

    out_t = pl.pallas_call(
        mlp_kernel,
        out_shape=jax.ShapeDtypeStruct((OUT_PAD, B_pad), jnp.float32),
        grid=(n_steps,),
        in_specs=in_specs,
        out_specs=out_spec,
        compiler_params=pltpu.CompilerParams(
            dimension_semantics=("parallel",)),
        cost_estimate=cost,
    )(x_t, *staged)

    # Tiny crop/transpose of the (8, B_pad) slab back to module semantics (B, 6).
    return out_t[:out_size, :B].T


def init_params(key, input_size, hidden_size, output_size):
    """Deterministic init mimicking torch.nn.Linear default U(-1/sqrt(in), 1/sqrt(in))."""
    sizes = [(input_size, hidden_size),
             (hidden_size, hidden_size),
             (hidden_size, hidden_size),
             (hidden_size, hidden_size),
             (hidden_size, output_size)]
    params = []
    for (fan_in, fan_out) in sizes:
        key, kw, kb = jax.random.split(key, 3)
        bound = 1.0 / jnp.sqrt(jnp.float32(fan_in))
        w = jax.random.uniform(kw, (fan_in, fan_out), jnp.float32, -bound, bound)
        b = jax.random.uniform(kb, (1, fan_out), jnp.float32, -bound, bound)
        params.append((w, b))
    return params


def reference_forward(x, params):
    """Pure-f32 JAX reference matching the PyTorch module semantics."""
    h = x
    for i, (w, b) in enumerate(params):
        h = h @ w + b
        if i < len(params) - 1:
            h = jnp.maximum(h, 0.0)
    return jax.nn.softmax(h, axis=-1)


if __name__ == "__main__":
    input_size = 8      # matches the module's input_size
    hidden_size = 32
    output_size = 6     # matches the module's output_size
    batch = 1024        # grid=(2,): both v7x TCs busy, near-zero extra cost on v5e/v6e

    key = jax.random.PRNGKey(0)
    key, kx = jax.random.split(key)
    x = jax.random.normal(kx, (batch, input_size), jnp.float32)

    params = init_params(key, input_size, hidden_size, output_size)

    out = net_forward(x, params)
    out = jax.block_until_ready(out)

    ref = reference_forward(x, params)
    assert out.shape == (batch, output_size)
    # bf16 MXU inputs + approx reciprocal -> compare with a modest tolerance.
    assert jnp.allclose(out, ref, atol=2e-2, rtol=0.0), "mismatch vs JAX reference"
    assert jnp.allclose(jnp.sum(out, axis=-1), 1.0, atol=5e-3), "softmax rows must sum to 1"

    print("KERNEL_OK")
</pallas_src>

<mosaic_0001>
module attributes {stable_mosaic.version = 11 : i64} {
  func.func @mlp_kernel(%arg0: i32, %arg1: memref<8x512xf32, #tpu.memory_space<vmem>>, %arg2: memref<32x8xbf16, #tpu.memory_space<vmem>>, %arg3: memref<32x1xf32, #tpu.memory_space<vmem>>, %arg4: memref<32x32xbf16, #tpu.memory_space<vmem>>, %arg5: memref<32x1xf32, #tpu.memory_space<vmem>>, %arg6: memref<32x32xbf16, #tpu.memory_space<vmem>>, %arg7: memref<32x1xf32, #tpu.memory_space<vmem>>, %arg8: memref<32x32xbf16, #tpu.memory_space<vmem>>, %arg9: memref<32x1xf32, #tpu.memory_space<vmem>>, %arg10: memref<8x32xbf16, #tpu.memory_space<vmem>>, %arg11: memref<8x1xf32, #tpu.memory_space<vmem>>, %arg12: memref<8x512xf32, #tpu.memory_space<vmem>>) attributes {dimension_semantics = [#tpu.dimension_semantics<parallel>], iteration_bounds = array<i64: 2>, scalar_prefetch = 0 : i64, scratch_operands = 0 : i64, tpu.core_type = #tpu.core_type<tc>, window_params = [{transform_indices = @transform_0, window_bounds = array<i64: 8, 512>}, {pipeline_mode = #tpu.pipeline_mode<synchronous>, transform_indices = @transform_1, window_bounds = array<i64: 32, 8>}, {pipeline_mode = #tpu.pipeline_mode<synchronous>, transform_indices = @transform_2, window_bounds = array<i64: 32, 1>}, {pipeline_mode = #tpu.pipeline_mode<synchronous>, transform_indices = @transform_3, window_bounds = array<i64: 32, 32>}, {pipeline_mode = #tpu.pipeline_mode<synchronous>, transform_indices = @transform_4, window_bounds = array<i64: 32, 1>}, {pipeline_mode = #tpu.pipeline_mode<synchronous>, transform_indices = @transform_5, window_bounds = array<i64: 32, 32>}, {pipeline_mode = #tpu.pipeline_mode<synchronous>, transform_indices = @transform_6, window_bounds = array<i64: 32, 1>}, {pipeline_mode = #tpu.pipeline_mode<synchronous>, transform_indices = @transform_7, window_bounds = array<i64: 32, 32>}, {pipeline_mode = #tpu.pipeline_mode<synchronous>, transform_indices = @transform_8, window_bounds = array<i64: 32, 1>}, {pipeline_mode = #tpu.pipeline_mode<synchronous>, transform_indices = @transform_9, window_bounds = array<i64: 8, 32>}, {pipeline_mode = #tpu.pipeline_mode<synchronous>, transform_indices = @transform_10, window_bounds = array<i64: 8, 1>}, {transform_indices = @transform_11, window_bounds = array<i64: 8, 512>}]} {
    %c0 = arith.constant 0 : index
    %c0_0 = arith.constant 0 : index
    %0 = vector.load %arg1[%c0, %c0_0] : memref<8x512xf32, #tpu.memory_space<vmem>>, vector<8x512xf32>
    %c0_1 = arith.constant 0 : index
    %c0_2 = arith.constant 0 : index
    %1 = vector.load %arg2[%c0_1, %c0_2] : memref<32x8xbf16, #tpu.memory_space<vmem>>, vector<32x8xbf16>
    %2 = arith.truncf %0 : vector<8x512xf32> to vector<8x512xbf16>
    %cst = arith.constant dense<0.000000e+00> : vector<32x512xf32>
    %3 = tpu.matmul %1, %2, %cst {dimension_numbers = #tpu.dot_dimension_numbers<[1], [0], [0], [1], [0, 0, 1, 1], [], []>} : vector<32x8xbf16>, vector<8x512xbf16>, vector<32x512xf32> -> vector<32x512xf32>
    %c0_3 = arith.constant 0 : index
    %c0_4 = arith.constant 0 : index
    %4 = vector.load %arg3[%c0_3, %c0_4] : memref<32x1xf32, #tpu.memory_space<vmem>>, vector<32x1xf32>
    %5 = vector.broadcast %4 : vector<32x1xf32> to vector<32x512xf32>
    %6 = arith.addf %3, %5 : vector<32x512xf32>
    %cst_5 = arith.constant 0.000000e+00 : f32
    %7 = vector.broadcast %cst_5 : f32 to vector<32x512xf32>
    %8 = arith.maximumf %6, %7 : vector<32x512xf32>
    %c0_6 = arith.constant 0 : index
    %c0_7 = arith.constant 0 : index
    %9 = vector.load %arg4[%c0_6, %c0_7] : memref<32x32xbf16, #tpu.memory_space<vmem>>, vector<32x32xbf16>
    %10 = arith.truncf %8 : vector<32x512xf32> to vector<32x512xbf16>
    %cst_8 = arith.constant dense<0.000000e+00> : vector<32x512xf32>
    %11 = tpu.matmul %9, %10, %cst_8 {dimension_numbers = #tpu.dot_dimension_numbers<[1], [0], [0], [1], [0, 0, 1, 1], [], []>} : vector<32x32xbf16>, vector<32x512xbf16>, vector<32x512xf32> -> vector<32x512xf32>
    %c0_9 = arith.constant 0 : index
    %c0_10 = arith.constant 0 : index
    %12 = vector.load %arg5[%c0_9, %c0_10] : memref<32x1xf32, #tpu.memory_space<vmem>>, vector<32x1xf32>
    %13 = vector.broadcast %12 : vector<32x1xf32> to vector<32x512xf32>
    %14 = arith.addf %11, %13 : vector<32x512xf32>
    %cst_11 = arith.constant 0.000000e+00 : f32
    %15 = vector.broadcast %cst_11 : f32 to vector<32x512xf32>
    %16 = arith.maximumf %14, %15 : vector<32x512xf32>
    %c0_12 = arith.constant 0 : index
    %c0_13 = arith.constant 0 : index
    %17 = vector.load %arg6[%c0_12, %c0_13] : memref<32x32xbf16, #tpu.memory_space<vmem>>, vector<32x32xbf16>
    %18 = arith.truncf %16 : vector<32x512xf32> to vector<32x512xbf16>
    %cst_14 = arith.constant dense<0.000000e+00> : vector<32x512xf32>
    %19 = tpu.matmul %17, %18, %cst_14 {dimension_numbers = #tpu.dot_dimension_numbers<[1], [0], [0], [1], [0, 0, 1, 1], [], []>} : vector<32x32xbf16>, vector<32x512xbf16>, vector<32x512xf32> -> vector<32x512xf32>
    %c0_15 = arith.constant 0 : index
    %c0_16 = arith.constant 0 : index
    %20 = vector.load %arg7[%c0_15, %c0_16] : memref<32x1xf32, #tpu.memory_space<vmem>>, vector<32x1xf32>
    %21 = vector.broadcast %20 : vector<32x1xf32> to vector<32x512xf32>
    %22 = arith.addf %19, %21 : vector<32x512xf32>
    %cst_17 = arith.constant 0.000000e+00 : f32
    %23 = vector.broadcast %cst_17 : f32 to vector<32x512xf32>
    %24 = arith.maximumf %22, %23 : vector<32x512xf32>
    %c0_18 = arith.constant 0 : index
    %c0_19 = arith.constant 0 : index
    %25 = vector.load %arg8[%c0_18, %c0_19] : memref<32x32xbf16, #tpu.memory_space<vmem>>, vector<32x32xbf16>
    %26 = arith.truncf %24 : vector<32x512xf32> to vector<32x512xbf16>
    %cst_20 = arith.constant dense<0.000000e+00> : vector<32x512xf32>
    %27 = tpu.matmul %25, %26, %cst_20 {dimension_numbers = #tpu.dot_dimension_numbers<[1], [0], [0], [1], [0, 0, 1, 1], [], []>} : vector<32x32xbf16>, vector<32x512xbf16>, vector<32x512xf32> -> vector<32x512xf32>
    %c0_21 = arith.constant 0 : index
    %c0_22 = arith.constant 0 : index
    %28 = vector.load %arg9[%c0_21, %c0_22] : memref<32x1xf32, #tpu.memory_space<vmem>>, vector<32x1xf32>
    %29 = vector.broadcast %28 : vector<32x1xf32> to vector<32x512xf32>
    %30 = arith.addf %27, %29 : vector<32x512xf32>
    %cst_23 = arith.constant 0.000000e+00 : f32
    %31 = vector.broadcast %cst_23 : f32 to vector<32x512xf32>
    %32 = arith.maximumf %30, %31 : vector<32x512xf32>
    %c0_24 = arith.constant 0 : index
    %c0_25 = arith.constant 0 : index
    %33 = vector.load %arg10[%c0_24, %c0_25] : memref<8x32xbf16, #tpu.memory_space<vmem>>, vector<8x32xbf16>
    %34 = arith.truncf %32 : vector<32x512xf32> to vector<32x512xbf16>
    %cst_26 = arith.constant dense<0.000000e+00> : vector<8x512xf32>
    %35 = tpu.matmul %33, %34, %cst_26 {dimension_numbers = #tpu.dot_dimension_numbers<[1], [0], [0], [1], [0, 0, 1, 1], [], []>} : vector<8x32xbf16>, vector<32x512xbf16>, vector<8x512xf32> -> vector<8x512xf32>
    %c0_27 = arith.constant 0 : index
    %c0_28 = arith.constant 0 : index
    %36 = vector.load %arg11[%c0_27, %c0_28] : memref<8x1xf32, #tpu.memory_space<vmem>>, vector<8x1xf32>
    %37 = vector.broadcast %36 : vector<8x1xf32> to vector<8x512xf32>
    %38 = arith.addf %35, %37 : vector<8x512xf32>
    %cst_29 = arith.constant dense<0xFF800000> : vector<512xf32>
    %39 = vector.multi_reduction <maximumf>, %38, %cst_29 [0] : vector<8x512xf32> to vector<512xf32>
    %40 = vector.shape_cast %39 : vector<512xf32> to vector<1x512xf32>
    %41 = vector.broadcast %40 : vector<1x512xf32> to vector<8x512xf32>
    %42 = arith.subf %38, %41 : vector<8x512xf32>
    %43 = math.exp %42 : vector<8x512xf32>
    %cst_30 = arith.constant dense<0.000000e+00> : vector<512xf32>
    %44 = vector.multi_reduction <add>, %43, %cst_30 [0] : vector<8x512xf32> to vector<512xf32>
    %45 = vector.shape_cast %44 : vector<512xf32> to vector<1x512xf32>
    %46 = tpu.reciprocal %45 {approx = true} : vector<1x512xf32> -> vector<1x512xf32>
    %47 = vector.broadcast %46 : vector<1x512xf32> to vector<8x512xf32>
    %48 = arith.mulf %43, %47 : vector<8x512xf32>
    %c0_31 = arith.constant 0 : index
    %c0_32 = arith.constant 0 : index
    %49 = vector.load %arg12[%c0_31, %c0_32] : memref<8x512xf32, #tpu.memory_space<vmem>>, vector<8x512xf32>
    tpu.vector_store %arg12[%c0_31, %c0_32], %48 {strides = array<i32>} : memref<8x512xf32, #tpu.memory_space<vmem>>, vector<8x512xf32>,
    return
  }
  func.func @transform_0(%arg0: i32) -> (i32, i32) {
    %c0_i32 = arith.constant 0 : i32
    %c0_i32_0 = arith.constant 0 : i32
    return %c0_i32, %arg0 : i32, i32
  }
  func.func @transform_1(%arg0: i32) -> (i32, i32) {
    %c0_i32 = arith.constant 0 : i32
    %c0_i32_0 = arith.constant 0 : i32
    %c0_i32_1 = arith.constant 0 : i32
    return %c0_i32, %c0_i32_0 : i32, i32
  }
  func.func @transform_2(%arg0: i32) -> (i32, i32) {
    %c0_i32 = arith.constant 0 : i32
    %c0_i32_0 = arith.constant 0 : i32
    %c0_i32_1 = arith.constant 0 : i32
    return %c0_i32, %c0_i32_0 : i32, i32
  }
  func.func @transform_3(%arg0: i32) -> (i32, i32) {
    %c0_i32 = arith.constant 0 : i32
    %c0_i32_0 = arith.constant 0 : i32
    %c0_i32_1 = arith.constant 0 : i32
    return %c0_i32, %c0_i32_0 : i32, i32
  }
  func.func @transform_4(%arg0: i32) -> (i32, i32) {
    %c0_i32 = arith.constant 0 : i32
    %c0_i32_0 = arith.constant 0 : i32
    %c0_i32_1 = arith.constant 0 : i32
    return %c0_i32, %c0_i32_0 : i32, i32
  }
  func.func @transform_5(%arg0: i32) -> (i32, i32) {
    %c0_i32 = arith.constant 0 : i32
    %c0_i32_0 = arith.constant 0 : i32
    %c0_i32_1 = arith.constant 0 : i32
    return %c0_i32, %c0_i32_0 : i32, i32
  }
  func.func @transform_6(%arg0: i32) -> (i32, i32) {
    %c0_i32 = arith.constant 0 : i32
    %c0_i32_0 = arith.constant 0 : i32
    %c0_i32_1 = arith.constant 0 : i32
    return %c0_i32, %c0_i32_0 : i32, i32
  }
  func.func @transform_7(%arg0: i32) -> (i32, i32) {
    %c0_i32 = arith.constant 0 : i32
    %c0_i32_0 = arith.constant 0 : i32
    %c0_i32_1 = arith.constant 0 : i32
    return %c0_i32, %c0_i32_0 : i32, i32
  }
  func.func @transform_8(%arg0: i32) -> (i32, i32) {
    %c0_i32 = arith.constant 0 : i32
    %c0_i32_0 = arith.constant 0 : i32
    %c0_i32_1 = arith.constant 0 : i32
    return %c0_i32, %c0_i32_0 : i32, i32
  }
  func.func @transform_9(%arg0: i32) -> (i32, i32) {
    %c0_i32 = arith.constant 0 : i32
    %c0_i32_0 = arith.constant 0 : i32
    %c0_i32_1 = arith.constant 0 : i32
    return %c0_i32, %c0_i32_0 : i32, i32
  }
  func.func @transform_10(%arg0: i32) -> (i32, i32) {
    %c0_i32 = arith.constant 0 : i32
    %c0_i32_0 = arith.constant 0 : i32
    %c0_i32_1 = arith.constant 0 : i32
    return %c0_i32, %c0_i32_0 : i32, i32
  }
  func.func @transform_11(%arg0: i32) -> (i32, i32) {
    %c0_i32 = arith.constant 0 : i32
    %c0_i32_0 = arith.constant 0 : i32
    return %c0_i32, %arg0 : i32, i32
  }
}

</mosaic_0001>

<bundles_post_ra>
// kernel: tpu_custom_call.1
= control target key start
LH: loop header
LB: loop body
LE: loop exit
PB: predicated region body
PF: predicated region fallthrough
CT: control target
= control target key end

     0   :  { %16 = vsyncpa [#allocation3], 0  ;;  %s1798_s0 = inlined_call_operand.vmem [shape: f32[8,1024], index: 0, kind: input, shape index: {}]   ;;  %s1799_s1 = inlined_call_operand.vmem [shape: bf16[32,8], index: 1, kind: input, shape index: {}]   ;;  %s1800_s2 = inlined_call_operand.vmem [shape: f32[32,1], index: 2, kind: input, shape index: {}]   ;;  %s1801_s3 = inlined_call_operand.vmem [shape: bf16[32,32], index: 3, kind: input, shape index: {}]   ;;  %s1802_s4 = inlined_call_operand.vmem [shape: f32[32,1], index: 4, kind: input, shape index: {}]   ;;  %s1803_s5 = inlined_call_operand.vmem [shape: bf16[32,32], index: 5, kind: input, shape index: {}]   ;;  %s1804_s6 = inlined_call_operand.vmem [shape: f32[32,1], index: 6, kind: input, shape index: {}]   ;;  %s1805_s7 = inlined_call_operand.vmem [shape: bf16[32,32], index: 7, kind: input, shape index: {}]   ;;  %s1806_s8 = inlined_call_operand.vmem [shape: f32[32,1], index: 8, kind: input, shape index: {}]   ;;  %s1807_s9 = inlined_call_operand.vmem [shape: bf16[8,32], index: 9, kind: input, shape index: {}]   ;;  %s1808_s10 = inlined_call_operand.vmem [shape: f32[8,1], index: 10, kind: input, shape index: {}]   ;;  %s1809_s11 = inlined_call_operand.hbm [shape: f32[8,1024], index: 11, kind: output, shape index: {}]  }
   0x1   :  { %18 = vsyncpa [#allocation3 + $0x1], 0  ;;  %s1579_s17 = smov 0   ;;  %s1581_s18 = smov 0  }
   0x2   :  { %s1583_s19 = smov 0   ;;  %s1585_s20 = smov 0  }
   0x3 LB: > { %s1600_s21 = sadd.s32 4294967295, %s1515_s20   ;;  %s1346_s22 = sadd.s32 4294967294, %s1515_s20   ;;  %s1515_s20 = sphi %s1585_s20, %s1817_s20   ;;  %s1511_s19 = sphi %s1583_s19, %s1816_s19   ;;  %s1507_s18 = sphi %s1581_s18, %s1815_s18   ;;  %s1503_s17 = sphi %s1579_s17, %s1814_s17  }
   0x4   : > { %s1604_s23 = sadd.s32 1, %s1515_s20   ;;  %s267_s24 = sadd.s32 1, %s1511_s19 }
   0x5   : > { %s264_s25 = ssub.s32 %s1515_s20, %s1604_s23  ;;  %p277_p0 = scmp.ne.s32.totalorder %s1511_s19, %s1507_s18 }
   0x6   : > { %p265_p1 = scmp.eq.s32.totalorder %s264_s25, 0  ;;  %p278_p2 = scmp.eq.s32.totalorder %s1600_s21, 1 }
   0x7   : > { %p283_p3 = scmp.ne.s32.totalorder %s1507_s18, %s1503_s17  ;;  %p284_p4 = scmp.eq.s32.totalorder %s1346_s22, 1 }
   0x8   : > { %s1615_s26 = scalar_select %p265_p1, %s1511_s19, %s267_s24  }
   0x9   : > { %p1617_p5 = por %p278_p2, %p277_p0  ;;  %p1621_p6 = por %p284_p4, %p283_p3 }
   0xa   : > { %1810 = sst [smem:[#allocation5_spill]] %s1615_s26  ;;  %p1349_p7 = scmp.ge.s32.totalorder %s1515_s20, 1 }
   0xb   : > { %p341_p8 = scmp.lt.s32.totalorder %s1515_s20, 3 }
   0xd   : > { %p342_p9 = pnand %p1349_p7, %p341_p8 }
   0xe   : > { %s1351_s29 = sshll.u32 (!%p342_p9), %s1600_s21, 2  ;;  %v1517_v0 = vmov (!%p342_p9), 0   ;;  %v401_v1 = vld [vmem:[%s1800_s2] sm:$0xff] (!%p342_p9)  ;;  %v403_v2 = vld [vmem:[%s1800_s2 + $0x10] sm:$0xff] (!%p342_p9)  ;;  %v402_v3 = vld [vmem:[%s1800_s2 + $0x8] sm:$0xff] (!%p342_p9)  ;;  %vm442_vm0 = vcmask (!%p342_p9), 1043456  }
   0xf   : > { %345 = sbr.rel (%p342_p9) target bundleno = 1247 (0x4df), region = 64  ;;  %p382_p10 = scmp.lt.s32.totalorder (!%p342_p9), %s1351_s29, 7  ;;  %487 = vmatprep.mubr.bf16.mxu0 (!%p342_p9), %v1517_v0  ;;  %540 = vmatprep.mubr.bf16.mxu1 (!%p342_p9), %v1517_v0  ;;  %v404_v4 = vld [vmem:[%s1800_s2 + $0x18] sm:$0xff] (!%p342_p9)  ;;  %v589_v12 = vld [vmem:[%s1802_s4] sm:$0xff] (!%p342_p9)  ;;  %v590_v15 = vld [vmem:[%s1802_s4 + $0x8] sm:$0xff] (!%p342_p9)  ;;  %vm435_vm1 = vcmask (!%p342_p9), 64512  }
  0x10   : > { %1427 = vset.pattern.permute.xlu0 (!%p342_p9), %v1517_v0  ;;  %1428 = vset.pattern.permute.xlu1 (!%p342_p9), %v1517_v0  ;;  %v1429_v14 = vld [vmem:[%s1799_s1] sm:$0xff] (!%p342_p9)   ;;  %v591_v18 = vld [vmem:[%s1802_s4 + $0x10] sm:$0xff] (!%p342_p9)  ;;  %v592_v19 = vld [vmem:[%s1802_s4 + $0x18] sm:$0xff] (!%p342_p9)  ;;  %vm623_vm2 = vcmask (!%p342_p9), 261120   ;;  %s378_s13 = sand.u32 (!%p342_p9), 1, %s1507_s18   ;;  %s1518_s30 = smov (!%p342_p9), [#allocation2]  }
  0x11   : > { %407 = vperm.xlu0 (!%p342_p9), %1427, %v401_v1   ;;  %417 = vperm.xlu1 (!%p342_p9), %1428, %v403_v2   ;;  %v764_v20 = vld [vmem:[%s1804_s6] sm:$0xff] (!%p342_p9)  ;;  %v1430_v21 = vld [vmem:[%s1799_s1 + $0x8] sm:$0xff] (!%p342_p9)   ;;  %v766_v23 = vld [vmem:[%s1804_s6 + $0x10] sm:$0xff] (!%p342_p9)  ;;  %s1350_s14 = sshll.u32 (!%p342_p9), %s378_s13, 5  ;;  %s1457_s12 = sshll.u32 (!%p342_p9), %s1518_s30, 4  ;;  %s1458_s12 = int_to_ptr.vmem [resolvable:$false] %s1457_s12 }
  0x12   : > { %v765_v22 = vld [vmem:[%s1804_s6 + $0x8] sm:$0xff] (!%p342_p9)  ;;  %v767_v24 = vld [vmem:[%s1804_s6 + $0x18] sm:$0xff] (!%p342_p9)  ;;  %v938_v25 = vld [vmem:[%s1806_s8] sm:$0xff] (!%p342_p9)  ;;  %s380_s15 = scalar_lea.vmem (!%p342_p9), [#allocation2], %s1350_s14  ;;  %s1459_s14 = scalar_lea.vmem (!%p342_p9), %s1458_s12, 1024 }
  0x13   : > { %v939_v26 = vld [vmem:[%s1806_s8 + $0x8] sm:$0xff] (!%p342_p9)  ;;  %v940_v27 = vld [vmem:[%s1806_s8 + $0x10] sm:$0xff] (!%p342_p9)  ;;  %v941_v28 = vld [vmem:[%s1806_s8 + $0x18] sm:$0xff] (!%p342_p9)  ;;  %s1287_s16 = sshll.u32 (!%p342_p9), %s380_s15, 4  ;;  %s1758_s16 = int_to_ptr.vmem [resolvable:$true] %s1287_s16 }
  0x14   : > { %v1109_v29 = vld [vmem:[%s1808_s10] sm:$0xff] (!%p342_p9)  ;;  %s1453_s25 = scalar_lea.vmem (!%p342_p9), %s1758_s16, 512  ;;  %p1460_p0 = scmp.lt.s32.totalorder (!%p342_p9), %s1758_s16, %s1458_s12 }
  0x15   : > { %412 = vperm.xlu0 (!%p342_p9), %1427, %v402_v3   ;;  %422 = vperm.xlu1 (!%p342_p9), %1428, %v404_v4   ;;  %p1454_p11 = scmp.ne.s32.totalorder (!%p342_p9), %s1758_s16, %s1453_s25  ;;  %p1461_p1 = scmp.lt.s32.totalorder (!%p342_p9), %s1459_s14, %s1453_s25 }
  0x16   : > { %s1819_s29 = smov (!%p382_p10, %s1351_s29), 7 }
  0x17   : > { %s1352_s22 = sshll.u32 %s1819_s29, 3  ;;  %s1386_s29 = sshll.u32 %s1600_s21, 9 }
  0x18   : > { %s385_s26 = scalar_lea.vmem %s1798_s0, %s1352_s22  ;;  %s1756_s24 = scalar_lea.hbm %s1809_s11, %s1386_s29 }
  0x19   : > { %v390_v5 = vld [vmem:[%s385_s26 + $0x8] sm:$0xff]  ;;  %v392_v6 = vld [vmem:[%s385_s26 + $0x18] sm:$0xff]  ;;  %v389_v7 = vld [vmem:[%s385_s26] sm:$0xff]  ;;  %595 = vperm.xlu0 %1427, %v589_v12   ;;  %600 = vperm.xlu1 %1428, %v590_v15   ;;  %s1273_s21 = scalar_lea.sflag [#allocation3], %s378_s13  ;;  %p1455_p12 = pnand %p1454_p11, %p1617_p5 }
  0x1a   : > { %v398_v8 = vpack.c.bf16 %v390_v5, %v390_v5  ;;  %v400_v9 = vpack.c.bf16 %v392_v6, %v392_v6  ;;  %v397_v10 = vpack.c.bf16 %v389_v7, %v389_v7  ;;  %v391_v11 = vld [vmem:[%s385_s26 + $0x10] sm:$0xff]  ;;  %p1462_p2 = por %p1461_p1, %p1460_p0 }
  0x1b   : > { %v399_v13 = vpack.c.bf16 %v391_v11, %v391_v11  ;;  %p1456_p13 = pneg %p1455_p12 }
  0x1c   : > { %1355 = vmatprep.subr.msk.bf16.mxu0 %vm442_vm0, %v398_v8  ;;  %1358 = vmatprep.subr.msk.bf16.mxu1 %vm442_vm0, %v400_v9  ;;  %v444_v16 = vsel %vm442_vm0, %v397_v10, 0 }
  0x1d   : > { %456 = vmatpush1.bf16.msra.mxu0 %v444_v16  ;;  %v450_v17 = vsel %vm442_vm0, %v399_v13, 0  ;;  %605 = vperm.xlu0 %1427, %v591_v18   ;;  %p1463_p3 = pnand %p1462_p2, %p1456_p13 }
  0x1e   : > { %509 = vmatpush1.bf16.msra.mxu1 %v450_v17  ;;  %610 = vperm.xlu1 %1428, %v592_v19  }
  0x20   : > { %1356 = vmatmul.mubr.msk.bf16.vlgmr.msra.gmra.mrb[0].mxu0 %vm435_vm1, %v1429_v14 }
  0x21   : > { %1359 = vmatmul.mubr.msk.bf16.vlgmr.msra.gmra.mrb[0].mxu1 %vm435_vm1, %v1429_v14  ;;  %497 = vmatprep.mubr.bf16.mxu0 %v1517_v0 }
  0x22   : > { %550 = vmatprep.mubr.bf16.mxu1 %v1517_v0  ;;  %770 = vperm.xlu0 %1427, %v764_v20  }
  0x23   : > { %775 = vperm.xlu1 %1428, %v765_v22  }
  0x26   : > { %780 = vperm.xlu0 %1427, %v766_v23  }
  0x27   : > { %785 = vperm.xlu1 %1428, %v767_v24  }
  0x28   : > { %1357 = vmatmul.mubr.msk.bf16.gmra.mrb[4].mxu0 %vm435_vm1, %v1430_v21 }
  0x29   : > { %1360 = vmatmul.mubr.msk.bf16.gmra.mrb[4].mxu1 %vm435_vm1, %v1430_v21  ;;  %662 = vmatprep.mubr.bf16.mxu0 %v1517_v0 }
  0x2a   : > { %715 = vmatprep.mubr.bf16.mxu1 %v1517_v0  ;;  %944 = vperm.xlu0 %1427, %v938_v25  }
  0x2b   : > { %949 = vperm.xlu1 %1428, %v939_v26  }
  0x2e   : > { %954 = vperm.xlu0 %1427, %v940_v27   ;;  %v1431_v27 = vld [vmem:[%s1801_s3] sm:$0xff]  }
  0x2f   : > { %959 = vperm.xlu1 %1428, %v941_v28   ;;  %v1432_v28 = vld [vmem:[%s1801_s3 + $0x8] sm:$0xff]  }
  0x32   : > { %1112 = vperm.xlu0 %1427, %v1109_v29  }
  0x90   : > { %v408_v30 = vpop.permute.xlu0 %407  ;;  %v418_v31 = vpop.permute.xlu1 %417 }
  0x94   : > { %v413_v32 = vpop.permute.xlu0 %412  ;;  %v423_v58 = vpop.permute.xlu1 %422 }
  0x98   : > { %v596_v29 = vpop.permute.xlu0 %595 }
  0xf3   : > { %v489_v33 = vpop.f32.mrb[0].mxu0 }
  0xf4   : > { %v490_v34 = vadd.f32 %v489_v33, %v408_v30  ;;  %v542_v35 = vpop.f32.mrb[0].mxu1  ;;  %v491_v36 = vpop.f32.mrb[1].mxu0 }
  0xf5   : > { %v543_v37 = vadd.f32 %v542_v35, %v408_v30  ;;  %v492_v38 = vadd.f32 %v491_v36, %v408_v30  ;;  %v544_v39 = vpop.f32.mrb[1].mxu1  ;;  %v493_v40 = vpop.f32.mrb[2].mxu0 }
  0xf6   : > { %v545_v41 = vadd.f32 %v544_v39, %v408_v30  ;;  %v494_v42 = vadd.f32 %v493_v40, %v413_v32  ;;  %v546_v43 = vpop.f32.mrb[2].mxu1  ;;  %v495_v44 = vpop.f32.mrb[3].mxu0  ;;  %v561_v48 = vmax.f32 %v490_v34, 0.0 }
  0xf7   : > { %v547_v45 = vadd.f32 %v546_v43, %v413_v32  ;;  %v496_v46 = vadd.f32 %v495_v44, %v413_v32  ;;  %v548_v47 = vpop.f32.mrb[3].mxu1  ;;  %v563_v51 = vmax.f32 %v543_v37, 0.0  ;;  %v562_v52 = vmax.f32 %v492_v38, 0.0  ;;  %v601_v30 = vpop.permute.xlu1 %600 }
  0xf8   : > { %v565_v49 = vmax.f32 %v494_v42, 0.0  ;;  %v549_v50 = vadd.f32 %v548_v47, %v413_v32  ;;  %v564_v55 = vmax.f32 %v545_v41, 0.0 }
  0xf9   : > { %v567_v53 = vmax.f32 %v547_v45, 0.0  ;;  %v566_v54 = vmax.f32 %v496_v46, 0.0 }
  0xfa   : > { %v581_v56 = vpack.c.bf16 %v565_v49, %v561_v48  ;;  %v568_v57 = vmax.f32 %v549_v50, 0.0 }
  0xfb   : > { %v583_v59 = vpack.c.bf16 %v567_v53, %v563_v51  ;;  %v582_v60 = vpack.c.bf16 %v566_v54, %v562_v52  ;;  %v499_v61 = vpop.f32.mrb[4].mxu0  ;;  %v606_v53 = vpop.permute.xlu0 %605 }
  0xfc   : > { %v584_v62 = vpack.c.bf16 %v568_v57, %v564_v55  ;;  %v500_v63 = vadd.f32 %v499_v61, %v418_v31  ;;  %v552_v1 = vpop.f32.mrb[4].mxu1  ;;  %v501_v2 = vpop.f32.mrb[5].mxu0 }
  0xfd   : > { %v553_v3 = vadd.f32 %v552_v1, %v418_v31  ;;  %v502_v4 = vadd.f32 %v501_v2, %v418_v31  ;;  %v554_v5 = vpop.f32.mrb[5].mxu1  ;;  %v503_v6 = vpop.f32.mrb[6].mxu0  ;;  %630 = vmatprep.subr.bf16.mxu0 %v582_v60 }
  0xfe   : > { %v555_v7 = vadd.f32 %v554_v5, %v418_v31  ;;  %v504_v8 = vadd.f32 %v503_v6, %v423_v58  ;;  %v556_v9 = vpop.f32.mrb[6].mxu1  ;;  %683 = vmatprep.subr.bf16.mxu1 %v584_v62  ;;  %v505_v10 = vpop.f32.mrb[7].mxu0  ;;  %631 = vmatpush1.bf16.msra.mxu0 %v581_v56  ;;  %v569_v14 = vmax.f32 %v500_v63, 0.0 }
  0xff   : > { %v557_v11 = vadd.f32 %v556_v9, %v423_v58  ;;  %v506_v12 = vadd.f32 %v505_v10, %v423_v58  ;;  %v558_v13 = vpop.f32.mrb[7].mxu1  ;;  %684 = vmatpush1.bf16.msra.mxu1 %v583_v59  ;;  %v571_v17 = vmax.f32 %v553_v3, 0.0  ;;  %v570_v18 = vmax.f32 %v502_v4, 0.0  ;;  %v611_v57 = vpop.permute.xlu1 %610 }
 0x100   : > { %v573_v15 = vmax.f32 %v504_v8, 0.0  ;;  %v559_v16 = vadd.f32 %v558_v13, %v423_v58  ;;  %v572_v21 = vmax.f32 %v555_v7, 0.0 }
 0x101   : > { %v575_v19 = vmax.f32 %v557_v11, 0.0  ;;  %v574_v20 = vmax.f32 %v506_v12, 0.0 }
 0x102   : > { %v585_v22 = vpack.c.bf16 %v573_v15, %v569_v14  ;;  %v576_v23 = vmax.f32 %v559_v16, 0.0 }
 0x103   : > { %v587_v24 = vpack.c.bf16 %v575_v19, %v571_v17  ;;  %v586_v25 = vpack.c.bf16 %v574_v20, %v570_v18 }
 0x104   : > { %v588_v26 = vpack.c.bf16 %v576_v23, %v572_v21 }
 0x105   : > { %632 = vmatprep.subr.bf16.mxu0 %v586_v25 }
 0x106   : > { %685 = vmatprep.subr.bf16.mxu1 %v588_v26  ;;  %633 = vmatpush1.bf16.msra.mxu0 %v585_v22  ;;  %v1433_v26 = vld [vmem:[%s1803_s5] sm:$0xff]  }
 0x107   : > { %686 = vmatpush1.bf16.msra.mxu1 %v587_v24 }
 0x109   : > { %1363 = vmatmul.mubr.msk.bf16.vlgmr.msra.gmra.mrb[8].mxu0 %vm623_vm2, %v1431_v27 }
 0x10a   : > { %1365 = vmatmul.mubr.msk.bf16.vlgmr.msra.gmra.mrb[8].mxu1 %vm623_vm2, %v1431_v27  ;;  %672 = vmatprep.mubr.bf16.mxu0 %v1517_v0  ;;  %v1434_v27 = vld [vmem:[%s1803_s5 + $0x8] sm:$0xff]  }
 0x10b   : > { %725 = vmatprep.mubr.bf16.mxu1 %v1517_v0 }
 0x111   : > { %1364 = vmatmul.mubr.msk.bf16.gmra.mrb[12].mxu0 %vm623_vm2, %v1432_v28 }
 0x112   : > { %1366 = vmatmul.mubr.msk.bf16.gmra.mrb[12].mxu1 %vm623_vm2, %v1432_v28  ;;  %836 = vmatprep.mubr.bf16.mxu0 %v1517_v0  ;;  %v771_v28 = vpop.permute.xlu0 %770 }
 0x113   : > { %889 = vmatprep.mubr.bf16.mxu1 %v1517_v0 }
 0x1dc   : > { %v664_v31 = vpop.f32.mrb[8].mxu0 }
 0x1dd   : > { %v665_v32 = vadd.f32 %v664_v31, %v596_v29  ;;  %v717_v33 = vpop.f32.mrb[8].mxu1  ;;  %v666_v34 = vpop.f32.mrb[9].mxu0 }
 0x1de   : > { %v718_v35 = vadd.f32 %v717_v33, %v596_v29  ;;  %v667_v36 = vadd.f32 %v666_v34, %v596_v29  ;;  %v719_v37 = vpop.f32.mrb[9].mxu1  ;;  %v668_v38 = vpop.f32.mrb[10].mxu0 }
 0x1df   : > { %v720_v39 = vadd.f32 %v719_v37, %v596_v29  ;;  %v669_v40 = vadd.f32 %v668_v38, %v601_v30  ;;  %v721_v41 = vpop.f32.mrb[10].mxu1  ;;  %v670_v42 = vpop.f32.mrb[11].mxu0  ;;  %v736_v46 = vmax.f32 %v665_v32, 0.0 }
 0x1e0   : > { %v722_v43 = vadd.f32 %v721_v41, %v601_v30  ;;  %v671_v44 = vadd.f32 %v670_v42, %v601_v30  ;;  %v723_v45 = vpop.f32.mrb[11].mxu1  ;;  %v738_v49 = vmax.f32 %v718_v35, 0.0  ;;  %v737_v50 = vmax.f32 %v667_v36, 0.0  ;;  %v776_v29 = vpop.permute.xlu1 %775 }
 0x1e1   : > { %v740_v47 = vmax.f32 %v669_v40, 0.0  ;;  %v724_v48 = vadd.f32 %v723_v45, %v601_v30  ;;  %v739_v54 = vmax.f32 %v720_v39, 0.0 }
 0x1e2   : > { %v742_v51 = vmax.f32 %v722_v43, 0.0  ;;  %v741_v52 = vmax.f32 %v671_v44, 0.0 }
 0x1e3   : > { %v756_v55 = vpack.c.bf16 %v740_v47, %v736_v46  ;;  %v743_v56 = vmax.f32 %v724_v48, 0.0 }
 0x1e4   : > { %v758_v58 = vpack.c.bf16 %v742_v51, %v738_v49  ;;  %v757_v59 = vpack.c.bf16 %v741_v52, %v737_v50  ;;  %v674_v60 = vpop.f32.mrb[12].mxu0  ;;  %v781_v52 = vpop.permute.xlu0 %780 }
 0x1e5   : > { %v759_v61 = vpack.c.bf16 %v743_v56, %v739_v54  ;;  %v675_v62 = vadd.f32 %v674_v60, %v606_v53  ;;  %v727_v63 = vpop.f32.mrb[12].mxu1  ;;  %v676_v1 = vpop.f32.mrb[13].mxu0 }
 0x1e6   : > { %v728_v2 = vadd.f32 %v727_v63, %v606_v53  ;;  %v677_v3 = vadd.f32 %v676_v1, %v606_v53  ;;  %v729_v4 = vpop.f32.mrb[13].mxu1  ;;  %v678_v5 = vpop.f32.mrb[14].mxu0  ;;  %804 = vmatprep.subr.bf16.mxu0 %v757_v59 }
 0x1e7   : > { %v730_v6 = vadd.f32 %v729_v4, %v606_v53  ;;  %v679_v7 = vadd.f32 %v678_v5, %v611_v57  ;;  %v731_v8 = vpop.f32.mrb[14].mxu1  ;;  %857 = vmatprep.subr.bf16.mxu1 %v759_v61  ;;  %v680_v9 = vpop.f32.mrb[15].mxu0  ;;  %805 = vmatpush1.bf16.msra.mxu0 %v756_v55  ;;  %v744_v13 = vmax.f32 %v675_v62, 0.0 }
 0x1e8   : > { %v732_v10 = vadd.f32 %v731_v8, %v611_v57  ;;  %v681_v11 = vadd.f32 %v680_v9, %v611_v57  ;;  %v733_v12 = vpop.f32.mrb[15].mxu1  ;;  %858 = vmatpush1.bf16.msra.mxu1 %v758_v58  ;;  %v746_v16 = vmax.f32 %v728_v2, 0.0  ;;  %v745_v17 = vmax.f32 %v677_v3, 0.0  ;;  %v786_v56 = vpop.permute.xlu1 %785 }
 0x1e9   : > { %v748_v14 = vmax.f32 %v679_v7, 0.0  ;;  %v734_v15 = vadd.f32 %v733_v12, %v611_v57  ;;  %v747_v20 = vmax.f32 %v730_v6, 0.0 }
 0x1ea   : > { %v750_v18 = vmax.f32 %v732_v10, 0.0  ;;  %v749_v19 = vmax.f32 %v681_v11, 0.0 }
 0x1eb   : > { %v760_v21 = vpack.c.bf16 %v748_v14, %v744_v13  ;;  %v751_v22 = vmax.f32 %v734_v15, 0.0 }
 0x1ec   : > { %v762_v23 = vpack.c.bf16 %v750_v18, %v746_v16  ;;  %v761_v24 = vpack.c.bf16 %v749_v19, %v745_v17 }
 0x1ed   : > { %v763_v25 = vpack.c.bf16 %v751_v22, %v747_v20 }
 0x1ee   : > { %806 = vmatprep.subr.bf16.mxu0 %v761_v24 }
 0x1ef   : > { %859 = vmatprep.subr.bf16.mxu1 %v763_v25  ;;  %807 = vmatpush1.bf16.msra.mxu0 %v760_v21  ;;  %v1435_v25 = vld [vmem:[%s1805_s7] sm:$0xff]  }
 0x1f0   : > { %860 = vmatpush1.bf16.msra.mxu1 %v762_v23 }
 0x1f2   : > { %1369 = vmatmul.mubr.msk.bf16.vlgmr.msra.gmra.mrb[16].mxu0 %vm623_vm2, %v1433_v26 }
 0x1f3   : > { %1371 = vmatmul.mubr.msk.bf16.vlgmr.msra.gmra.mrb[16].mxu1 %vm623_vm2, %v1433_v26  ;;  %846 = vmatprep.mubr.bf16.mxu0 %v1517_v0  ;;  %v1436_v26 = vld [vmem:[%s1805_s7 + $0x8] sm:$0xff]  }
 0x1f4   : > { %899 = vmatprep.mubr.bf16.mxu1 %v1517_v0 }
 0x1fa   : > { %1370 = vmatmul.mubr.msk.bf16.gmra.mrb[20].mxu0 %vm623_vm2, %v1434_v27 }
 0x1fb   : > { %1372 = vmatmul.mubr.msk.bf16.gmra.mrb[20].mxu1 %vm623_vm2, %v1434_v27  ;;  %1010 = vmatprep.mubr.bf16.mxu0 %v1517_v0  ;;  %v945_v27 = vpop.permute.xlu0 %944 }
 0x1fc   : > { %1063 = vmatprep.mubr.bf16.mxu1 %v1517_v0 }
 0x2c5   : > { %v838_v30 = vpop.f32.mrb[16].mxu0 }
 0x2c6   : > { %v839_v31 = vadd.f32 %v838_v30, %v771_v28  ;;  %v891_v32 = vpop.f32.mrb[16].mxu1  ;;  %v840_v33 = vpop.f32.mrb[17].mxu0 }
 0x2c7   : > { %v892_v34 = vadd.f32 %v891_v32, %v771_v28  ;;  %v841_v35 = vadd.f32 %v840_v33, %v771_v28  ;;  %v893_v36 = vpop.f32.mrb[17].mxu1  ;;  %v842_v37 = vpop.f32.mrb[18].mxu0 }
 0x2c8   : > { %v894_v38 = vadd.f32 %v893_v36, %v771_v28  ;;  %v843_v39 = vadd.f32 %v842_v37, %v776_v29  ;;  %v895_v40 = vpop.f32.mrb[18].mxu1  ;;  %v844_v41 = vpop.f32.mrb[19].mxu0  ;;  %v910_v45 = vmax.f32 %v839_v31, 0.0 }
 0x2c9   : > { %v896_v42 = vadd.f32 %v895_v40, %v776_v29  ;;  %v845_v43 = vadd.f32 %v844_v41, %v776_v29  ;;  %v897_v44 = vpop.f32.mrb[19].mxu1  ;;  %v912_v48 = vmax.f32 %v892_v34, 0.0  ;;  %v911_v49 = vmax.f32 %v841_v35, 0.0  ;;  %v950_v28 = vpop.permute.xlu1 %949 }
 0x2ca   : > { %v914_v46 = vmax.f32 %v843_v39, 0.0  ;;  %v898_v47 = vadd.f32 %v897_v44, %v776_v29  ;;  %v913_v53 = vmax.f32 %v894_v38, 0.0 }
 0x2cb   : > { %v916_v50 = vmax.f32 %v896_v42, 0.0  ;;  %v915_v51 = vmax.f32 %v845_v43, 0.0 }
 0x2cc   : > { %v930_v54 = vpack.c.bf16 %v914_v46, %v910_v45  ;;  %v917_v55 = vmax.f32 %v898_v47, 0.0 }
 0x2cd   : > { %v932_v57 = vpack.c.bf16 %v916_v50, %v912_v48  ;;  %v931_v58 = vpack.c.bf16 %v915_v51, %v911_v49  ;;  %v848_v59 = vpop.f32.mrb[20].mxu0  ;;  %v955_v50 = vpop.permute.xlu0 %954 }
 0x2ce   : > { %v933_v60 = vpack.c.bf16 %v917_v55, %v913_v53  ;;  %v849_v61 = vadd.f32 %v848_v59, %v781_v52  ;;  %v901_v62 = vpop.f32.mrb[20].mxu1  ;;  %v850_v63 = vpop.f32.mrb[21].mxu0 }
 0x2cf   : > { %v902_v1 = vadd.f32 %v901_v62, %v781_v52  ;;  %v851_v2 = vadd.f32 %v850_v63, %v781_v52  ;;  %v903_v3 = vpop.f32.mrb[21].mxu1  ;;  %v852_v4 = vpop.f32.mrb[22].mxu0  ;;  %978 = vmatprep.subr.bf16.mxu0 %v931_v58 }
 0x2d0   : > { %v904_v5 = vadd.f32 %v903_v3, %v781_v52  ;;  %v853_v6 = vadd.f32 %v852_v4, %v786_v56  ;;  %v905_v7 = vpop.f32.mrb[22].mxu1  ;;  %1031 = vmatprep.subr.bf16.mxu1 %v933_v60  ;;  %v854_v8 = vpop.f32.mrb[23].mxu0  ;;  %979 = vmatpush1.bf16.msra.mxu0 %v930_v54  ;;  %v918_v12 = vmax.f32 %v849_v61, 0.0 }
 0x2d1   : > { %v906_v9 = vadd.f32 %v905_v7, %v786_v56  ;;  %v855_v10 = vadd.f32 %v854_v8, %v786_v56  ;;  %v907_v11 = vpop.f32.mrb[23].mxu1  ;;  %1032 = vmatpush1.bf16.msra.mxu1 %v932_v57  ;;  %v920_v15 = vmax.f32 %v902_v1, 0.0  ;;  %v919_v16 = vmax.f32 %v851_v2, 0.0  ;;  %v960_v54 = vpop.permute.xlu1 %959 }
 0x2d2   : > { %v922_v13 = vmax.f32 %v853_v6, 0.0  ;;  %v908_v14 = vadd.f32 %v907_v11, %v786_v56  ;;  %v921_v19 = vmax.f32 %v904_v5, 0.0 }
 0x2d3   : > { %v924_v17 = vmax.f32 %v906_v9, 0.0  ;;  %v923_v18 = vmax.f32 %v855_v10, 0.0 }
 0x2d4   : > { %v934_v20 = vpack.c.bf16 %v922_v13, %v918_v12  ;;  %v925_v21 = vmax.f32 %v908_v14, 0.0 }
 0x2d5   : > { %v936_v22 = vpack.c.bf16 %v924_v17, %v920_v15  ;;  %v935_v23 = vpack.c.bf16 %v923_v18, %v919_v16 }
 0x2d6   : > { %v937_v24 = vpack.c.bf16 %v925_v21, %v921_v19 }
 0x2d7   : > { %980 = vmatprep.subr.bf16.mxu0 %v935_v23  ;;  %v1100_v23 = vld [vmem:[%s1807_s9] sm:$0xf] }
 0x2d8   : > { %1033 = vmatprep.subr.bf16.mxu1 %v937_v24  ;;  %981 = vmatpush1.bf16.msra.mxu0 %v934_v20  ;;  %v1113_v24 = vpop.permute.xlu0 %1112 }
 0x2d9   : > { %1034 = vmatpush1.bf16.msra.mxu1 %v936_v22 }
 0x2db   : > { %1375 = vmatmul.mubr.msk.bf16.vlgmr.msra.gmra.mrb[24].mxu0 %vm623_vm2, %v1435_v25 }
 0x2dc   : > { %1377 = vmatmul.mubr.msk.bf16.vlgmr.msra.gmra.mrb[24].mxu1 %vm623_vm2, %v1435_v25  ;;  %1020 = vmatprep.mubr.bf16.mxu0 %v1517_v0 }
 0x2dd   : > { %1073 = vmatprep.mubr.bf16.mxu1 %v1517_v0 }
 0x2e3   : > { %1376 = vmatmul.mubr.msk.bf16.gmra.mrb[28].mxu0 %vm623_vm2, %v1436_v26 }
 0x2e4   : > { %1378 = vmatmul.mubr.msk.bf16.gmra.mrb[28].mxu1 %vm623_vm2, %v1436_v26  ;;  %1150 = vmatprep.mubr.bf16.mxu0 %v1517_v0 }
 0x2e5   : > { %1191 = vmatprep.mubr.bf16.mxu1 %v1517_v0 }
 0x3ae   : > { %v1012_v29 = vpop.f32.mrb[24].mxu0 }
 0x3af   : > { %v1013_v30 = vadd.f32 %v1012_v29, %v945_v27  ;;  %v1065_v31 = vpop.f32.mrb[24].mxu1  ;;  %v1014_v32 = vpop.f32.mrb[25].mxu0 }
 0x3b0   : > { %v1066_v33 = vadd.f32 %v1065_v31, %v945_v27  ;;  %v1015_v34 = vadd.f32 %v1014_v32, %v945_v27  ;;  %v1067_v35 = vpop.f32.mrb[25].mxu1  ;;  %v1016_v36 = vpop.f32.mrb[26].mxu0 }
 0x3b1   : > { %v1068_v37 = vadd.f32 %v1067_v35, %v945_v27  ;;  %v1017_v38 = vadd.f32 %v1016_v36, %v950_v28  ;;  %v1069_v39 = vpop.f32.mrb[26].mxu1  ;;  %v1018_v40 = vpop.f32.mrb[27].mxu0  ;;  %v1084_v44 = vmax.f32 %v1013_v30, 0.0 }
 0x3b2   : > { %v1070_v41 = vadd.f32 %v1069_v39, %v950_v28  ;;  %v1019_v42 = vadd.f32 %v1018_v40, %v950_v28  ;;  %v1071_v43 = vpop.f32.mrb[27].mxu1  ;;  %v1086_v46 = vmax.f32 %v1066_v33, 0.0  ;;  %v1085_v47 = vmax.f32 %v1015_v34, 0.0 }
 0x3b3   : > { %v1088_v45 = vmax.f32 %v1017_v38, 0.0  ;;  %v1072_v0 = vadd.f32 %v1071_v43, %v950_v28  ;;  %v1087_v51 = vmax.f32 %v1068_v37, 0.0 }
 0x3b4   : > { %v1090_v48 = vmax.f32 %v1070_v41, 0.0  ;;  %v1089_v49 = vmax.f32 %v1019_v42, 0.0 }
 0x3b5   : > { %v1101_v52 = vpack.c.bf16 %v1088_v45, %v1084_v44  ;;  %v1091_v53 = vmax.f32 %v1072_v0, 0.0 }
 0x3b6   : > { %v1103_v55 = vpack.c.bf16 %v1090_v48, %v1086_v46  ;;  %v1102_v56 = vpack.c.bf16 %v1089_v49, %v1085_v47  ;;  %v1022_v57 = vpop.f32.mrb[28].mxu0 }
 0x3b7   : > { %v1104_v58 = vpack.c.bf16 %v1091_v53, %v1087_v51  ;;  %v1023_v59 = vadd.f32 %v1022_v57, %v955_v50  ;;  %v1075_v60 = vpop.f32.mrb[28].mxu1  ;;  %v1024_v61 = vpop.f32.mrb[29].mxu0 }
 0x3b8   : > { %v1076_v62 = vadd.f32 %v1075_v60, %v955_v50  ;;  %v1025_v63 = vadd.f32 %v1024_v61, %v955_v50  ;;  %v1077_v1 = vpop.f32.mrb[29].mxu1  ;;  %v1026_v2 = vpop.f32.mrb[30].mxu0  ;;  %1118 = vmatprep.subr.bf16.mxu0 %v1102_v56 }
 0x3b9   : > { %v1078_v3 = vadd.f32 %v1077_v1, %v955_v50  ;;  %v1027_v4 = vadd.f32 %v1026_v2, %v960_v54  ;;  %v1079_v5 = vpop.f32.mrb[30].mxu1  ;;  %1159 = vmatprep.subr.bf16.mxu1 %v1104_v58  ;;  %v1028_v6 = vpop.f32.mrb[31].mxu0  ;;  %1119 = vmatpush1.bf16.msra.mxu0 %v1101_v52  ;;  %v1092_v10 = vmax.f32 %v1023_v59, 0.0 }
 0x3ba   : > { %v1080_v7 = vadd.f32 %v1079_v5, %v960_v54  ;;  %v1029_v8 = vadd.f32 %v1028_v6, %v960_v54  ;;  %v1081_v9 = vpop.f32.mrb[31].mxu1  ;;  %1160 = vmatpush1.bf16.msra.mxu1 %v1103_v55  ;;  %v1094_v13 = vmax.f32 %v1076_v62, 0.0  ;;  %v1093_v14 = vmax.f32 %v1025_v63, 0.0 }
 0x3bb   : > { %v1096_v11 = vmax.f32 %v1027_v4, 0.0  ;;  %v1082_v12 = vadd.f32 %v1081_v9, %v960_v54  ;;  %v1095_v17 = vmax.f32 %v1078_v3, 0.0 }
 0x3bc   : > { %v1098_v15 = vmax.f32 %v1080_v7, 0.0  ;;  %v1097_v16 = vmax.f32 %v1029_v8, 0.0 }
 0x3bd   : > { %v1105_v18 = vpack.c.bf16 %v1096_v11, %v1092_v10  ;;  %v1099_v19 = vmax.f32 %v1082_v12, 0.0 }
 0x3be   : > { %v1107_v20 = vpack.c.bf16 %v1098_v15, %v1094_v13  ;;  %v1106_v21 = vpack.c.bf16 %v1097_v16, %v1093_v14 }
 0x3bf   : > { %v1108_v22 = vpack.c.bf16 %v1099_v19, %v1095_v17 }
 0x3c0   : > { %1120 = vmatprep.subr.bf16.mxu0 %v1106_v21 }
 0x3c1   : > { %1161 = vmatprep.subr.bf16.mxu1 %v1108_v22  ;;  %1121 = vmatpush1.bf16.msra.mxu0 %v1105_v18 }
 0x3c2   : > { %1162 = vmatpush1.bf16.msra.mxu1 %v1107_v20 }
 0x3c4   : > { %1379 = vmatmul.mubr.msk.bf16.vlgmr.msra.gmra.mrb[32].mxu0 %vm623_vm2, %v1100_v23 }
 0x3c5   : > { %1380 = vmatmul.mubr.msk.bf16.vlgmr.msra.gmra.mrb[32].mxu1 %vm623_vm2, %v1100_v23 }
 0x497   : > { %v1152_v25 = vpop.f32.mrb[32].mxu0 }
 0x498   : > { %v1153_v26 = vadd.f32 %v1152_v25, %v1113_v24  ;;  %v1193_v27 = vpop.f32.mrb[32].mxu1  ;;  %v1154_v28 = vpop.f32.mrb[33].mxu0 }
 0x499   : > { %v1194_v29 = vadd.f32 %v1193_v27, %v1113_v24  ;;  %v1155_v30 = vadd.f32 %v1154_v28, %v1113_v24  ;;  %v1195_v31 = vpop.f32.mrb[33].mxu1  ;;  %v1156_v32 = vpop.f32.mrb[34].mxu0 }
 0x49a   : > { %v1200_v33 = vrot.slane %v1153_v26, 4  ;;  %v1196_v34 = vadd.f32 %v1195_v31, %v1113_v24  ;;  %v1197_v35 = vpop.f32.mrb[34].mxu1  ;;  %v1157_v36 = vpop.f32.mrb[35].mxu0 }
 0x49b   : > { %v1212_v37 = vrot.slane %v1194_v29, 4  ;;  %v1206_v38 = vrot.slane %v1155_v30, 4  ;;  %v1198_v39 = vpop.f32.mrb[35].mxu1 }
 0x49c   : > { %v1201_v40 = vmax.f32 %v1153_v26, %v1200_v33  ;;  %v1218_v41 = vrot.slane %v1196_v34, 4 }
 0x49d   : > { %v1213_v42 = vmax.f32 %v1194_v29, %v1212_v37  ;;  %v1207_v43 = vmax.f32 %v1155_v30, %v1206_v38 }
 0x49e   : > { %v1202_v44 = vrot.slane %v1201_v40, 2  ;;  %v1219_v45 = vmax.f32 %v1196_v34, %v1218_v41 }
 0x49f   : > { %v1214_v0 = vrot.slane %v1213_v42, 2  ;;  %v1208_v46 = vrot.slane %v1207_v43, 2 }
 0x4a0   : > { %v1203_v47 = vmax.f32 %v1201_v40, %v1202_v44  ;;  %v1220_v48 = vrot.slane %v1219_v45, 2 }
 0x4a1   : > { %v1215_v49 = vmax.f32 %v1213_v42, %v1214_v0  ;;  %v1209_v50 = vmax.f32 %v1207_v43, %v1208_v46 }
 0x4a2   : > { %v1204_v51 = vrot.slane %v1203_v47, 1  ;;  %v1221_v52 = vmax.f32 %v1219_v45, %v1220_v48 }
 0x4a3   : > { %v1216_v53 = vrot.slane %v1215_v49, 1  ;;  %v1210_v54 = vrot.slane %v1209_v50, 1 }
 0x4a4   : > { %v1205_v55 = vmax.f32 %v1203_v47, %v1204_v51  ;;  %v1222_v56 = vrot.slane %v1221_v52, 1 }
 0x4a5   : > { %v1217_v57 = vmax.f32 %v1215_v49, %v1216_v53  ;;  %v1211_v58 = vmax.f32 %v1209_v50, %v1210_v54 }
 0x4a6   : > { %v1224_v59 = vsub.f32 %v1153_v26, %v1205_v55  ;;  %v1223_v60 = vmax.f32 %v1221_v52, %v1222_v56 }
 0x4a7   : > { %v1226_v61 = vsub.f32 %v1194_v29, %v1217_v57  ;;  %v1225_v62 = vsub.f32 %v1155_v30, %v1211_v58 }
 0x4a8   : > { %v1228_v63 = vmul.f32 1.442695, %v1224_v59  ;;  %v1227_v1 = vsub.f32 %v1196_v34, %v1223_v60 }
 0x4a9   : > { %v1232_v2 = vmul.f32 1.442695, %v1226_v61  ;;  %v1230_v3 = vmul.f32 1.442695, %v1225_v62 }
 0x4aa   : > { %1437 = vpow2.f32 %v1228_v63  ;;  %v1234_v4 = vmul.f32 1.442695, %v1227_v1 }
 0x4ab   : > { %1439 = vpow2.f32 %v1232_v2 }
 0x4ac   : > { %1441 = vpow2.f32 %v1230_v3 }
 0x4ad   : > { %1443 = vpow2.f32 %v1234_v4 }
 0x4b4   : > { %v1438_v5 = vpop.eup %1437 }
 0x4b5   : > { %v1440_v6 = vpop.eup %1439  ;;  %v1236_v7 = vrot.slane %v1438_v5, 4 }
 0x4b6   : > { %v1442_v8 = vpop.eup %1441  ;;  %v1248_v9 = vrot.slane %v1440_v6, 4 }
 0x4b7   : > { %v1444_v10 = vpop.eup %1443  ;;  %v1242_v11 = vrot.slane %v1442_v8, 4  ;;  %v1237_v12 = vadd.f32 %v1438_v5, %v1236_v7 }
 0x4b8   : > { %v1254_v13 = vrot.slane %v1444_v10, 4  ;;  %v1249_v14 = vadd.f32 %v1440_v6, %v1248_v9 }
 0x4b9   : > { %v1238_v15 = vrot.slane %v1237_v12, 2  ;;  %v1243_v16 = vadd.f32 %v1442_v8, %v1242_v11 }
 0x4ba   : > { %v1250_v17 = vrot.slane %v1249_v14, 2  ;;  %v1255_v18 = vadd.f32 %v1444_v10, %v1254_v13 }
 0x4bb   : > { %v1239_v19 = vadd.f32 %v1238_v15, %v1237_v12  ;;  %v1244_v20 = vrot.slane %v1243_v16, 2 }
 0x4bc   : > { %v1251_v21 = vadd.f32 %v1250_v17, %v1249_v14  ;;  %v1256_v22 = vrot.slane %v1255_v18, 2 }
 0x4bd   : > { %v1240_v23 = vrot.slane %v1239_v19, 1  ;;  %v1245_v24 = vadd.f32 %v1244_v20, %v1243_v16 }
 0x4be   : > { %v1252_v25 = vrot.slane %v1251_v21, 1  ;;  %v1257_v26 = vadd.f32 %v1256_v22, %v1255_v18 }
 0x4bf   : > { %v1241_v27 = vadd.f32 %v1240_v23, %v1239_v19  ;;  %v1246_v28 = vrot.slane %v1245_v24, 1 }
 0x4c0   : > { %v1253_v29 = vadd.f32 %v1252_v25, %v1251_v21  ;;  %v1258_v30 = vrot.slane %v1257_v26, 1 }
 0x4c1   : > { %v1247_v31 = vadd.f32 %v1246_v28, %v1245_v24  ;;  %1445 = vrcp.f32 %v1241_v27 }
 0x4c2   : > { %v1259_v32 = vadd.f32 %v1258_v30, %v1257_v26  ;;  %1447 = vrcp.f32 %v1253_v29 }
 0x4c3   : > { %1449 = vrcp.f32 %v1247_v31 }
 0x4c4   : > { %1451 = vrcp.f32 %v1259_v32 }
 0x4cb   : > { %v1446_v33 = vpop.eup %1445 }
 0x4cc   : > { %v1448_v34 = vpop.eup %1447  ;;  %v1264_v35 = vmul.f32 %v1446_v33, %v1438_v5 }
 0x4cd   : > { %v1450_v36 = vpop.eup %1449  ;;  %v1266_v37 = vmul.f32 %v1448_v34, %v1440_v6 }
 0x4ce   : > { %v1452_v38 = vpop.eup %1451  ;;  %v1265_v39 = vmul.f32 %v1450_v36, %v1442_v8  ;;  %1268 = vst [vmem:[%s380_s15] sm:$0xff] %v1264_v35 }
 0x4cf   : > { %v1267_v40 = vmul.f32 %v1452_v38, %v1444_v10  ;;  %1270 = vst [vmem:[%s380_s15 + $0x10] sm:$0xff] %v1266_v37 }
 0x4d0   : > { %1269 = vst [vmem:[%s380_s15 + $0x8] sm:$0xff] %v1265_v39 }
 0x4d1   : > { %1271 = vst [vmem:[%s380_s15 + $0x18] sm:$0xff] %v1267_v40 }
 0x4d2   : > { %1466 = shalt.err (!%p1463_p3)
}
 0x4d3   : > { %s1467_s13 = scalar_lea.hbm %s1756_s24, 512  ;;  %s1471_s22 = scalar_lea.hbm %s1809_s11, 1024 }
 0x4d4   : > { %p1468_p4 = scmp.ne.s32.totalorder %s1756_s24, %s1467_s13  ;;  %p1472_p9 = scmp.lt.u32.totalorder %s1756_s24, %s1809_s11 }
 0x4d5   : > { %p1473_p10 = scmp.lt.u32.totalorder %s1471_s22, %s1467_s13  ;;  %p1475_p12 = scmp.lt.u32.totalorder %s1467_s13, %s1756_s24 }
 0x4d6   : > { %p1469_p7 = pnand %p1468_p4, %p1617_p5 }
 0x4d7   : > { %p1474_p11 = por %p1473_p10, %p1472_p9 }
 0x4d8   : > { %p1470_p8 = pneg %p1469_p7 }
 0x4d9   : > { %p1476_p13 = por %p1475_p12, %p1474_p11 }
 0x4db   : > { %p1477_p0 = pnand %p1476_p13, %p1470_p8 }
 0x4dd   : > { %1480 = shalt.err (!%p1477_p0)
}
 0x4de   : > { %1387 = dma.vmem_to_hbm [thread:$0]  (%p1617_p5), %s1758_s16, 512, %s1756_s24, %s1273_s21  }
 0x4df PF: > { %p1393_p1 = scmp.ge.s32.totalorder %s1515_s20, 2  ;;  %s1299_s25 = sand.u32 1, %s1503_s17  }
 0x4e0   : > { %s1300_s12 = scalar_lea.sflag [#allocation3], %s1299_s25 }
 0x4e1   : > { %p1390_p2 = pnand %p1393_p1, %p1621_p6 }
 0x4e3   : > { %1498 = dma.done.wait (!%p1390_p2), %s1300_s12, 512  }
 0x4e4   : > { %1500 = vsyncadd (!%p1390_p2), %s1300_s12, 4294966784  ;;  %s1813_s14 = sld [smem:[#allocation5_spill]]  ;;  %p21_p3 = scmp.ge.s32.totalorder %s1604_s23, 4  }
 0x4e5   : > { %s1814_s17 = smov %s1507_s18  ;;  %s1815_s18 = smov %s1511_s19 }
 0x4e6   : > { %s1817_s20 = smov %s1604_s23  ;;  %23 = sbr.rel (!%p21_p3) target bundleno = 3 (0x3), region = 99 }
 0x4ea   : > { %s1816_s19 = smov %s1813_s14 }
 0x4ed   :  { %1305 = vsyncpa [#allocation3], 1 }
 0x4ee   :  { %1307 = vsyncpa [#allocation3 + $0x1], 1 }

</bundles_post_ra>
